<compile_context>
chip_gen: v6e
topology: v6e:2x2x1
jax: 0.10.0
libtpu: 0.0.40
codegen_flags: <defaults>
</compile_context>

<pallas_src>
import functools

import jax
import jax.numpy as jnp
from jax.experimental import pallas as pl
from jax.experimental.pallas import tpu as pltpu

BN_EPS = 1e-5


# ---------------------------------------------------------------------------
# Fused Pallas kernel: 1x1(all branches+res) -> temporal stage -> +res -> store
# ---------------------------------------------------------------------------
def _mstcn_kernel(x_ref, w1t_ref, s1_ref, b1_ref, nrelu_ref,
                  wt_ref, s2_ref, b2_ref, o_ref, act_ref, *,
                  K, dilations, cb, T, V, PADL, identity_residual):
    nb = x_ref.shape[0]
    nd = len(dilations)
    L = T * V
    H = max(max((K - 1) * d // 2 for d in dilations), 1)
    HV = H * V
    cres = (nd + 2) * cb                                   # residual row offset
    zpad = jnp.zeros(((nd + 1) * cb, HV), jnp.float32)

    for s in range(nb):                                    # static, small
        xs = x_ref[s]                                      # (Cin, L) f32

        # ---- stage 1: fused all-branch (+residual) 1x1 conv, folded BN,
        #      selective ReLU.  Channels land on sublanes (NCHW-native).
        y = jnp.dot(w1t_ref[...], xs, preferred_element_type=jnp.float32)
        y = y * s1_ref[...] + b1_ref[...]
        # nrelu==1 -> keep y (no ReLU), nrelu==0 -> max(y, 0)
        y = jnp.maximum(y, y * nrelu_ref[...])

        # ---- stash activations in VMEM with zero time padding on the lane
        #      axis (only the rows that are ever read through the pad).
        act_ref[0:(nd + 1) * cb, PADL - HV:PADL] = zpad
        act_ref[0:(nd + 1) * cb, PADL + L:PADL + L + HV] = zpad
        act_ref[:, PADL:PADL + L] = y

        def res_rows(c0, w):
            if identity_residual:
                return xs[c0:c0 + w, :]                    # f32, exact
            return act_ref[cres + c0:cres + c0 + w, PADL:PADL + L]

        # ---- stage 2a: dilated K-tap temporal convs (+BN), per-tap MXU dots
        for b, d in enumerate(dilations):
            pad = (K - 1) * d // 2
            c0 = b * cb
            acc = None
            for k in range(K):
                off = PADL + (k * d - pad) * V             # static lane shift
                tap = act_ref[c0:c0 + cb, off:off + L]     # (cb, L)
                z = jnp.dot(wt_ref[b * K + k], tap,
                            preferred_element_type=jnp.float32)
                acc = z if acc is None else acc + z
            acc = acc * s2_ref[c0:c0 + cb] + b2_ref[c0:c0 + cb]
            o_ref[s, c0:c0 + cb, :] = (acc + res_rows(c0, cb)).astype(o_ref.dtype)

        # ---- stage 2b: max-pool(3,1) branch + BN (zero pad ok: input >= 0)
        cmp = nd * cb
        p0 = act_ref[cmp:cmp + cb, PADL - V:PADL - V + L]
        p1 = act_ref[cmp:cmp + cb, PADL:PADL + L]
        p2 = act_ref[cmp:cmp + cb, PADL + V:PADL + V + L]
        m = jnp.maximum(jnp.maximum(p0, p1), p2)
        m = m * s2_ref[cmp:cmp + cb] + b2_ref[cmp:cmp + cb]
        o_ref[s, cmp:cmp + cb, :] = (m + res_rows(cmp, cb)).astype(o_ref.dtype)

        # ---- stage 2c: plain 1x1 branch (already BN'd, no ReLU): passthrough
        cpw = (nd + 1) * cb
        pw = act_ref[cpw:cpw + cb, PADL:PADL + L]
        o_ref[s, cpw:cpw + cb, :] = (pw + res_rows(cpw, cb)).astype(o_ref.dtype)


# ---------------------------------------------------------------------------
# Wrapper
# ---------------------------------------------------------------------------
def _pick_batch_block(N, Cin, Cout, L):
    """Samples per grid step: divisor of N, keep >= 2 parallel grid steps when
    possible (megacore / dual-TC), bound the per-step I/O block to ~4 MiB."""
    per = (Cin + Cout) * L * 4
    best = 1
    for nb in range(1, min(N, 8) + 1):
        if N % nb:
            continue
        if N // nb < 2 and N >= 2:
            break
        if nb * per <= (4 << 20):
            best = nb
    return best


def multiscale_temporal_conv(x_nchw, params):
    N, Cin, T, V = x_nchw.shape
    K = params["kernel_size"]
    dilations = params["dilations"]
    cb = params["cb"]
    nd = len(dilations)
    Cout = (nd + 2) * cb
    Ctot = params["w1t"].shape[0]
    L = T * V
    H = max(max((K - 1) * d // 2 for d in dilations), 1)
    HV = H * V
    PADL = -(-HV // 128) * 128          # lane-aligned left pad for the scratch
    Lpad = PADL + L + HV

    x3 = x_nchw.reshape(N, Cin, L)      # free (row-major bitcast), no transpose
    nb = _pick_batch_block(N, Cin, Cout, L)

    kern = functools.partial(
        _mstcn_kernel, K=K, dilations=tuple(dilations), cb=cb, T=T, V=V,
        PADL=PADL, identity_residual=params["identity_residual"])

    out = pl.pallas_call(
        kern,
        out_shape=jax.ShapeDtypeStruct((N, Cout, L), jnp.float32),
        grid=(N // nb,),
        in_specs=[
            pl.BlockSpec((nb, Cin, L), lambda n: (n, 0, 0)),
            pl.BlockSpec(params["w1t"].shape, lambda n: (0, 0)),
            pl.BlockSpec(params["s1"].shape, lambda n: (0, 0)),
            pl.BlockSpec(params["b1"].shape, lambda n: (0, 0)),
            pl.BlockSpec(params["nrelu"].shape, lambda n: (0, 0)),
            pl.BlockSpec(params["wt"].shape, lambda n: (0, 0, 0)),
            pl.BlockSpec(params["s2"].shape, lambda n: (0, 0)),
            pl.BlockSpec(params["b2"].shape, lambda n: (0, 0)),
        ],
        out_specs=pl.BlockSpec((nb, Cout, L), lambda n: (n, 0, 0)),
        scratch_shapes=[pltpu.VMEM((Ctot, Lpad), jnp.float32)],
        compiler_params=pltpu.CompilerParams(
            dimension_semantics=("parallel",),
            vmem_limit_bytes=32 * 1024 * 1024),
    )(x3, params["w1t"], params["s1"], params["b1"], params["nrelu"],
      params["wt"], params["s2"], params["b2"])

    return out.reshape(N, Cout, T, V)   # free (row-major bitcast)


# ---------------------------------------------------------------------------
# Parameter init (deterministic; mirrors weights_init + eval-mode BN defaults),
# pre-packed/fused for the kernel.
# ---------------------------------------------------------------------------
def init_params(key, in_channels, out_channels, kernel_size=3,
                dilations=(1, 2, 3, 4)):
    nd = len(dilations)
    nbr = nd + 2
    assert out_channels % nbr == 0, "# out channels should be multiple of # branches"
    assert kernel_size % 2 == 1, "odd temporal kernel assumed (module default 3)"
    cb = out_channels // nbr
    identity_res = (in_channels == out_channels)          # stride==1 assumed
    keys = iter(jax.random.split(key, 4 * nbr + 8))

    def kaiming(k, shape, fan_out):   # kaiming_normal_, mode='fan_out'
        return jax.random.normal(k, shape, jnp.float32) * jnp.sqrt(2.0 / fan_out)

    def bn_fold(k, c):  # gamma ~ N(1,.02), beta=0, running stats (0,1), bias=0
        gamma = 1.0 + 0.02 * jax.random.normal(k, (c,), jnp.float32)
        scale = gamma / jnp.sqrt(1.0 + BN_EPS)
        shift = jnp.zeros((c,), jnp.float32)
        return scale, shift

    w1t_rows, s1, b1, nrelu = [], [], [], []
    wts, s2, b2 = [], [], []

    for d in dilations:                                   # dilated branches
        w1t_rows.append(kaiming(next(keys), (cb, in_channels), cb))
        s, b = bn_fold(next(keys), cb); s1.append(s); b1.append(b)
        nrelu.append(jnp.zeros((cb,), jnp.float32))       # ReLU applied
        wt = kaiming(next(keys), (cb, cb, kernel_size), cb * kernel_size)
        wts.append(jnp.transpose(wt, (2, 0, 1)))          # (K, co, ci)
        s, b = bn_fold(next(keys), cb); s2.append(s); b2.append(b)

    # max-pool branch: 1x1 + BN + ReLU -> MaxPool(3,1) -> BN
    w1t_rows.append(kaiming(next(keys), (cb, in_channels), cb))
    s, b = bn_fold(next(keys), cb); s1.append(s); b1.append(b)
    nrelu.append(jnp.zeros((cb,), jnp.float32))
    s, b = bn_fold(next(keys), cb); s2.append(s); b2.append(b)

    # plain 1x1 branch: 1x1 + BN (no ReLU)
    w1t_rows.append(kaiming(next(keys), (cb, in_channels), cb))
    s, b = bn_fold(next(keys), cb); s1.append(s); b1.append(b)
    nrelu.append(jnp.ones((cb,), jnp.float32))

    # residual = TemporalConv(in, out, kernel=1) when in != out (stride=1)
    if not identity_res:
        w1t_rows.append(kaiming(next(keys), (out_channels, in_channels),
                                out_channels))
        s, b = bn_fold(next(keys), out_channels); s1.append(s); b1.append(b)
        nrelu.append(jnp.ones((out_channels,), jnp.float32))

    return dict(
        w1t=jnp.concatenate(w1t_rows, axis=0),            # (Ctot, Cin) f32
        s1=jnp.concatenate(s1)[:, None],                  # (Ctot, 1)
        b1=jnp.concatenate(b1)[:, None],
        nrelu=jnp.concatenate(nrelu)[:, None],            # 1 => skip ReLU
        wt=jnp.concatenate(wts, axis=0),                  # (nd*K, cb, cb)
        s2=jnp.concatenate(s2)[:, None],                  # ((nd+1)*cb, 1)
        b2=jnp.concatenate(b2)[:, None],
        kernel_size=kernel_size, dilations=tuple(dilations), cb=cb,
        out_channels=out_channels, identity_residual=identity_res,
    )


# ---------------------------------------------------------------------------
# Pure-JAX reference (same folded params) for a correctness spot-check.
# ---------------------------------------------------------------------------
def _reference_forward(x, params):
    N, Cin, T, V = x.shape
    K = params["kernel_size"]; dils = params["dilations"]; cb = params["cb"]
    nd = len(dils)
    hp = jax.lax.Precision.HIGHEST
    w1t = params["w1t"]
    s1 = params["s1"][:, 0]; b1 = params["b1"][:, 0]; nr = params["nrelu"][:, 0]
    wt = params["wt"]; s2 = params["s2"][:, 0]; b2 = params["b2"][:, 0]

    y = jnp.einsum('oc,nctv->notv', w1t, x, precision=hp)
    y = y * s1[None, :, None, None] + b1[None, :, None, None]
    y = jnp.where(nr[None, :, None, None] > 0, y, jnp.maximum(y, 0.0))

    outs = []
    for b, d in enumerate(dils):
        pad = (K - 1) * d // 2
        yb = y[:, b * cb:(b + 1) * cb]
        yp = jnp.pad(yb, ((0, 0), (0, 0), (pad, pad), (0, 0)))
        acc = 0.0
        for k in range(K):
            acc = acc + jnp.einsum('oi,nitv->notv', wt[b * K + k],
                                   yp[:, :, k * d:k * d + T], precision=hp)
        acc = acc * s2[None, b * cb:(b + 1) * cb, None, None] \
            + b2[None, b * cb:(b + 1) * cb, None, None]
        outs.append(acc)

    cmp = nd * cb
    yp = jnp.pad(y[:, cmp:cmp + cb], ((0, 0), (0, 0), (1, 1), (0, 0)),
                 constant_values=-jnp.inf)
    m = jnp.maximum(jnp.maximum(yp[:, :, 0:T], yp[:, :, 1:T + 1]),
                    yp[:, :, 2:T + 2])
    m = m * s2[None, cmp:cmp + cb, None, None] + b2[None, cmp:cmp + cb, None, None]
    outs.append(m)

    cpw = (nd + 1) * cb
    outs.append(y[:, cpw:cpw + cb])

    out = jnp.concatenate(outs, axis=1)
    if params["identity_residual"]:
        out = out + x
    else:
        cres = (nd + 2) * cb
        out = out + y[:, cres:cres + params["out_channels"]]
    return out


# ---------------------------------------------------------------------------
if __name__ == "__main__":
    key = jax.random.PRNGKey(0)
    kx, kp = jax.random.split(key)

    N, Cin, T, V = 2, 4, 16, 16          # x: (batch, channels, time, joints)
    out_channels = 12                    # divisible by num_branches = 6

    x = jax.random.normal(kx, (N, Cin, T, V), jnp.float32)
    params = init_params(kp, Cin, out_channels, kernel_size=3,
                         dilations=(1, 2, 3, 4))

    fwd = jax.jit(lambda xx: multiscale_temporal_conv(xx, params))
    out = jax.block_until_ready(fwd(x))

    assert out.shape == (N, out_channels, T, V)
    assert bool(jnp.all(jnp.isfinite(out)))
    ref = _reference_forward(x, params)
    err = float(jnp.max(jnp.abs(out - ref)))
    assert err < 5e-2, f"kernel vs reference max abs err = {err}"
    print("KERNEL_OK")
</pallas_src>

<mosaic_0001>
module attributes {stable_mosaic.version = 11 : i64} {
  func.func @_mstcn_kernel(%arg0: i32, %arg1: memref<1x4x256xf32, #tpu.memory_space<vmem>>, %arg2: memref<24x4xf32, #tpu.memory_space<vmem>>, %arg3: memref<24x1xf32, #tpu.memory_space<vmem>>, %arg4: memref<24x1xf32, #tpu.memory_space<vmem>>, %arg5: memref<24x1xf32, #tpu.memory_space<vmem>>, %arg6: memref<12x2x2xf32, #tpu.memory_space<vmem>>, %arg7: memref<10x1xf32, #tpu.memory_space<vmem>>, %arg8: memref<10x1xf32, #tpu.memory_space<vmem>>, %arg9: memref<1x12x256xf32, #tpu.memory_space<vmem>>, %arg10: memref<24x448xf32, #tpu.memory_space<vmem>>) attributes {dimension_semantics = [#tpu.dimension_semantics<parallel>], iteration_bounds = array<i64: 2>, scalar_prefetch = 0 : i64, scratch_operands = 1 : i64, tpu.core_type = #tpu.core_type<tc>, window_params = [{transform_indices = @transform_0, window_bounds = array<i64: 1, 4, 256>}, {pipeline_mode = #tpu.pipeline_mode<synchronous>, transform_indices = @transform_1, window_bounds = array<i64: 24, 4>}, {pipeline_mode = #tpu.pipeline_mode<synchronous>, transform_indices = @transform_2, window_bounds = array<i64: 24, 1>}, {pipeline_mode = #tpu.pipeline_mode<synchronous>, transform_indices = @transform_3, window_bounds = array<i64: 24, 1>}, {pipeline_mode = #tpu.pipeline_mode<synchronous>, transform_indices = @transform_4, window_bounds = array<i64: 24, 1>}, {pipeline_mode = #tpu.pipeline_mode<synchronous>, transform_indices = @transform_5, window_bounds = array<i64: 12, 2, 2>}, {pipeline_mode = #tpu.pipeline_mode<synchronous>, transform_indices = @transform_6, window_bounds = array<i64: 10, 1>}, {pipeline_mode = #tpu.pipeline_mode<synchronous>, transform_indices = @transform_7, window_bounds = array<i64: 10, 1>}, {transform_indices = @transform_8, window_bounds = array<i64: 1, 12, 256>}]} {
    %cst = arith.constant 0.000000e+00 : f32
    %0 = vector.broadcast %cst : f32 to vector<10x64xf32>
    %c0 = arith.constant 0 : index
    %c0_0 = arith.constant 0 : index
    %c0_1 = arith.constant 0 : index
    %1 = vector.load %arg1[%c0, %c0_0, %c0_1] : memref<1x4x256xf32, #tpu.memory_space<vmem>>, vector<1x4x256xf32>
    %2 = vector.shape_cast %1 : vector<1x4x256xf32> to vector<4x256xf32>
    %c0_2 = arith.constant 0 : index
    %c0_3 = arith.constant 0 : index
    %3 = vector.load %arg2[%c0_2, %c0_3] : memref<24x4xf32, #tpu.memory_space<vmem>>, vector<24x4xf32>
    %cst_4 = arith.constant dense<0.000000e+00> : vector<24x256xf32>
    %4 = tpu.matmul %3, %2, %cst_4 {dimension_numbers = #tpu.dot_dimension_numbers<[1], [0], [0], [1], [0, 0, 1, 1], [], []>} : vector<24x4xf32>, vector<4x256xf32>, vector<24x256xf32> -> vector<24x256xf32>
    %c0_5 = arith.constant 0 : index
    %c0_6 = arith.constant 0 : index
    %5 = vector.load %arg3[%c0_5, %c0_6] : memref<24x1xf32, #tpu.memory_space<vmem>>, vector<24x1xf32>
    %6 = vector.broadcast %5 : vector<24x1xf32> to vector<24x256xf32>
    %7 = arith.mulf %4, %6 : vector<24x256xf32>
    %c0_7 = arith.constant 0 : index
    %c0_8 = arith.constant 0 : index
    %8 = vector.load %arg4[%c0_7, %c0_8] : memref<24x1xf32, #tpu.memory_space<vmem>>, vector<24x1xf32>
    %9 = vector.broadcast %8 : vector<24x1xf32> to vector<24x256xf32>
    %10 = arith.addf %7, %9 : vector<24x256xf32>
    %c0_9 = arith.constant 0 : index
    %c0_10 = arith.constant 0 : index
    %11 = vector.load %arg5[%c0_9, %c0_10] : memref<24x1xf32, #tpu.memory_space<vmem>>, vector<24x1xf32>
    %12 = vector.broadcast %11 : vector<24x1xf32> to vector<24x256xf32>
    %13 = arith.mulf %10, %12 : vector<24x256xf32>
    %14 = arith.maximumf %10, %13 : vector<24x256xf32>
    %c0_11 = arith.constant 0 : index
    %c64 = arith.constant 64 : index
    %15 = vector.load %arg10[%c0_11, %c64] : memref<24x448xf32, #tpu.memory_space<vmem>>, vector<10x64xf32>
    tpu.vector_store %arg10[%c0_11, %c64], %0 {strides = array<i32>} : memref<24x448xf32, #tpu.memory_space<vmem>>, vector<10x64xf32>,
    %c0_12 = arith.constant 0 : index
    %c384 = arith.constant 384 : index
    %16 = vector.load %arg10[%c0_12, %c384] : memref<24x448xf32, #tpu.memory_space<vmem>>, vector<10x64xf32>
    tpu.vector_store %arg10[%c0_12, %c384], %0 {strides = array<i32>} : memref<24x448xf32, #tpu.memory_space<vmem>>, vector<10x64xf32>,
    %c0_13 = arith.constant 0 : index
    %c128 = arith.constant 128 : index
    %17 = vector.load %arg10[%c0_13, %c128] : memref<24x448xf32, #tpu.memory_space<vmem>>, vector<24x256xf32>
    tpu.vector_store %arg10[%c0_13, %c128], %14 {strides = array<i32>} : memref<24x448xf32, #tpu.memory_space<vmem>>, vector<24x256xf32>,
    %c0_14 = arith.constant 0 : index
    %c112 = arith.constant 112 : index
    %18 = vector.load %arg10[%c0_14, %c112] : memref<24x448xf32, #tpu.memory_space<vmem>>, vector<2x256xf32>
    %c0_15 = arith.constant 0 : index
    %c0_16 = arith.constant 0 : index
    %c0_17 = arith.constant 0 : index
    %19 = vector.load %arg6[%c0_15, %c0_16, %c0_17] : memref<12x2x2xf32, #tpu.memory_space<vmem>>, vector<1x2x2xf32>
    %20 = vector.shape_cast %19 : vector<1x2x2xf32> to vector<2x2xf32>
    %cst_18 = arith.constant dense<0.000000e+00> : vector<2x256xf32>
    %21 = tpu.matmul %20, %18, %cst_18 {dimension_numbers = #tpu.dot_dimension_numbers<[1], [0], [0], [1], [0, 0, 1, 1], [], []>} : vector<2x2xf32>, vector<2x256xf32>, vector<2x256xf32> -> vector<2x256xf32>
    %c0_19 = arith.constant 0 : index
    %c128_20 = arith.constant 128 : index
    %22 = vector.load %arg10[%c0_19, %c128_20] : memref<24x448xf32, #tpu.memory_space<vmem>>, vector<2x256xf32>
    %c1 = arith.constant 1 : index
    %c0_21 = arith.constant 0 : index
    %c0_22 = arith.constant 0 : index
    %23 = vector.load %arg6[%c1, %c0_21, %c0_22] : memref<12x2x2xf32, #tpu.memory_space<vmem>>, vector<1x2x2xf32>
    %24 = vector.shape_cast %23 : vector<1x2x2xf32> to vector<2x2xf32>
    %cst_23 = arith.constant dense<0.000000e+00> : vector<2x256xf32>
    %25 = tpu.matmul %24, %22, %cst_23 {dimension_numbers = #tpu.dot_dimension_numbers<[1], [0], [0], [1], [0, 0, 1, 1], [], []>} : vector<2x2xf32>, vector<2x256xf32>, vector<2x256xf32> -> vector<2x256xf32>
    %26 = arith.addf %21, %25 : vector<2x256xf32>
    %c0_24 = arith.constant 0 : index
    %c144 = arith.constant 144 : index
    %27 = vector.load %arg10[%c0_24, %c144] : memref<24x448xf32, #tpu.memory_space<vmem>>, vector<2x256xf32>
    %c2 = arith.constant 2 : index
    %c0_25 = arith.constant 0 : index
    %c0_26 = arith.constant 0 : index
    %28 = vector.load %arg6[%c2, %c0_25, %c0_26] : memref<12x2x2xf32, #tpu.memory_space<vmem>>, vector<1x2x2xf32>
    %29 = vector.shape_cast %28 : vector<1x2x2xf32> to vector<2x2xf32>
    %cst_27 = arith.constant dense<0.000000e+00> : vector<2x256xf32>
    %30 = tpu.matmul %29, %27, %cst_27 {dimension_numbers = #tpu.dot_dimension_numbers<[1], [0], [0], [1], [0, 0, 1, 1], [], []>} : vector<2x2xf32>, vector<2x256xf32>, vector<2x256xf32> -> vector<2x256xf32>
    %31 = arith.addf %26, %30 : vector<2x256xf32>
    %c0_28 = arith.constant 0 : index
    %c0_29 = arith.constant 0 : index
    %32 = vector.load %arg7[%c0_28, %c0_29] : memref<10x1xf32, #tpu.memory_space<vmem>>, vector<2x1xf32>
    %33 = vector.broadcast %32 : vector<2x1xf32> to vector<2x256xf32>
    %34 = arith.mulf %31, %33 : vector<2x256xf32>
    %c0_30 = arith.constant 0 : index
    %c0_31 = arith.constant 0 : index
    %35 = vector.load %arg8[%c0_30, %c0_31] : memref<10x1xf32, #tpu.memory_space<vmem>>, vector<2x1xf32>
    %36 = vector.broadcast %35 : vector<2x1xf32> to vector<2x256xf32>
    %37 = arith.addf %34, %36 : vector<2x256xf32>
    %c12 = arith.constant 12 : index
    %c128_32 = arith.constant 128 : index
    %38 = vector.load %arg10[%c12, %c128_32] : memref<24x448xf32, #tpu.memory_space<vmem>>, vector<2x256xf32>
    %39 = arith.addf %37, %38 : vector<2x256xf32>
    %c0_33 = arith.constant 0 : index
    %c0_34 = arith.constant 0 : index
    %c0_35 = arith.constant 0 : index
    %40 = vector.load %arg9[%c0_33, %c0_34, %c0_35] : memref<1x12x256xf32, #tpu.memory_space<vmem>>, vector<1x2x256xf32>
    %41 = vector.shape_cast %40 : vector<1x2x256xf32> to vector<2x256xf32>
    %42 = vector.shape_cast %39 : vector<2x256xf32> to vector<1x2x256xf32>
    tpu.vector_store %arg9[%c0_33, %c0_34, %c0_35], %42 {strides = array<i32>} : memref<1x12x256xf32, #tpu.memory_space<vmem>>, vector<1x2x256xf32>,
    %c2_36 = arith.constant 2 : index
    %c96 = arith.constant 96 : index
    %43 = vector.load %arg10[%c2_36, %c96] : memref<24x448xf32, #tpu.memory_space<vmem>>, vector<2x256xf32>
    %c3 = arith.constant 3 : index
    %c0_37 = arith.constant 0 : index
    %c0_38 = arith.constant 0 : index
    %44 = vector.load %arg6[%c3, %c0_37, %c0_38] : memref<12x2x2xf32, #tpu.memory_space<vmem>>, vector<1x2x2xf32>
    %45 = vector.shape_cast %44 : vector<1x2x2xf32> to vector<2x2xf32>
    %cst_39 = arith.constant dense<0.000000e+00> : vector<2x256xf32>
    %46 = tpu.matmul %45, %43, %cst_39 {dimension_numbers = #tpu.dot_dimension_numbers<[1], [0], [0], [1], [0, 0, 1, 1], [], []>} : vector<2x2xf32>, vector<2x256xf32>, vector<2x256xf32> -> vector<2x256xf32>
    %c2_40 = arith.constant 2 : index
    %c128_41 = arith.constant 128 : index
    %47 = vector.load %arg10[%c2_40, %c128_41] : memref<24x448xf32, #tpu.memory_space<vmem>>, vector<2x256xf32>
    %c4 = arith.constant 4 : index
    %c0_42 = arith.constant 0 : index
    %c0_43 = arith.constant 0 : index
    %48 = vector.load %arg6[%c4, %c0_42, %c0_43] : memref<12x2x2xf32, #tpu.memory_space<vmem>>, vector<1x2x2xf32>
    %49 = vector.shape_cast %48 : vector<1x2x2xf32> to vector<2x2xf32>
    %cst_44 = arith.constant dense<0.000000e+00> : vector<2x256xf32>
    %50 = tpu.matmul %49, %47, %cst_44 {dimension_numbers = #tpu.dot_dimension_numbers<[1], [0], [0], [1], [0, 0, 1, 1], [], []>} : vector<2x2xf32>, vector<2x256xf32>, vector<2x256xf32> -> vector<2x256xf32>
    %51 = arith.addf %46, %50 : vector<2x256xf32>
    %c2_45 = arith.constant 2 : index
    %c160 = arith.constant 160 : index
    %52 = vector.load %arg10[%c2_45, %c160] : memref<24x448xf32, #tpu.memory_space<vmem>>, vector<2x256xf32>
    %c5 = arith.constant 5 : index
    %c0_46 = arith.constant 0 : index
    %c0_47 = arith.constant 0 : index
    %53 = vector.load %arg6[%c5, %c0_46, %c0_47] : memref<12x2x2xf32, #tpu.memory_space<vmem>>, vector<1x2x2xf32>
    %54 = vector.shape_cast %53 : vector<1x2x2xf32> to vector<2x2xf32>
    %cst_48 = arith.constant dense<0.000000e+00> : vector<2x256xf32>
    %55 = tpu.matmul %54, %52, %cst_48 {dimension_numbers = #tpu.dot_dimension_numbers<[1], [0], [0], [1], [0, 0, 1, 1], [], []>} : vector<2x2xf32>, vector<2x256xf32>, vector<2x256xf32> -> vector<2x256xf32>
    %56 = arith.addf %51, %55 : vector<2x256xf32>
    %c2_49 = arith.constant 2 : index
    %c0_50 = arith.constant 0 : index
    %57 = vector.load %arg7[%c2_49, %c0_50] : memref<10x1xf32, #tpu.memory_space<vmem>>, vector<2x1xf32>
    %58 = vector.broadcast %57 : vector<2x1xf32> to vector<2x256xf32>
    %59 = arith.mulf %56, %58 : vector<2x256xf32>
    %c2_51 = arith.constant 2 : index
    %c0_52 = arith.constant 0 : index
    %60 = vector.load %arg8[%c2_51, %c0_52] : memref<10x1xf32, #tpu.memory_space<vmem>>, vector<2x1xf32>
    %61 = vector.broadcast %60 : vector<2x1xf32> to vector<2x256xf32>
    %62 = arith.addf %59, %61 : vector<2x256xf32>
    %c14 = arith.constant 14 : index
    %c128_53 = arith.constant 128 : index
    %63 = vector.load %arg10[%c14, %c128_53] : memref<24x448xf32, #tpu.memory_space<vmem>>, vector<2x256xf32>
    %64 = arith.addf %62, %63 : vector<2x256xf32>
    %c0_54 = arith.constant 0 : index
    %c2_55 = arith.constant 2 : index
    %c0_56 = arith.constant 0 : index
    %65 = vector.load %arg9[%c0_54, %c2_55, %c0_56] : memref<1x12x256xf32, #tpu.memory_space<vmem>>, vector<1x2x256xf32>
    %66 = vector.shape_cast %65 : vector<1x2x256xf32> to vector<2x256xf32>
    %67 = vector.shape_cast %64 : vector<2x256xf32> to vector<1x2x256xf32>
    tpu.vector_store %arg9[%c0_54, %c2_55, %c0_56], %67 {strides = array<i32>} : memref<1x12x256xf32, #tpu.memory_space<vmem>>, vector<1x2x256xf32>,
    %c4_57 = arith.constant 4 : index
    %c80 = arith.constant 80 : index
    %68 = vector.load %arg10[%c4_57, %c80] : memref<24x448xf32, #tpu.memory_space<vmem>>, vector<2x256xf32>
    %c6 = arith.constant 6 : index
    %c0_58 = arith.constant 0 : index
    %c0_59 = arith.constant 0 : index
    %69 = vector.load %arg6[%c6, %c0_58, %c0_59] : memref<12x2x2xf32, #tpu.memory_space<vmem>>, vector<1x2x2xf32>
    %70 = vector.shape_cast %69 : vector<1x2x2xf32> to vector<2x2xf32>
    %cst_60 = arith.constant dense<0.000000e+00> : vector<2x256xf32>
    %71 = tpu.matmul %70, %68, %cst_60 {dimension_numbers = #tpu.dot_dimension_numbers<[1], [0], [0], [1], [0, 0, 1, 1], [], []>} : vector<2x2xf32>, vector<2x256xf32>, vector<2x256xf32> -> vector<2x256xf32>
    %c4_61 = arith.constant 4 : index
    %c128_62 = arith.constant 128 : index
    %72 = vector.load %arg10[%c4_61, %c128_62] : memref<24x448xf32, #tpu.memory_space<vmem>>, vector<2x256xf32>
    %c7 = arith.constant 7 : index
    %c0_63 = arith.constant 0 : index
    %c0_64 = arith.constant 0 : index
    %73 = vector.load %arg6[%c7, %c0_63, %c0_64] : memref<12x2x2xf32, #tpu.memory_space<vmem>>, vector<1x2x2xf32>
    %74 = vector.shape_cast %73 : vector<1x2x2xf32> to vector<2x2xf32>
    %cst_65 = arith.constant dense<0.000000e+00> : vector<2x256xf32>
    %75 = tpu.matmul %74, %72, %cst_65 {dimension_numbers = #tpu.dot_dimension_numbers<[1], [0], [0], [1], [0, 0, 1, 1], [], []>} : vector<2x2xf32>, vector<2x256xf32>, vector<2x256xf32> -> vector<2x256xf32>
    %76 = arith.addf %71, %75 : vector<2x256xf32>
    %c4_66 = arith.constant 4 : index
    %c176 = arith.constant 176 : index
    %77 = vector.load %arg10[%c4_66, %c176] : memref<24x448xf32, #tpu.memory_space<vmem>>, vector<2x256xf32>
    %c8 = arith.constant 8 : index
    %c0_67 = arith.constant 0 : index
    %c0_68 = arith.constant 0 : index
    %78 = vector.load %arg6[%c8, %c0_67, %c0_68] : memref<12x2x2xf32, #tpu.memory_space<vmem>>, vector<1x2x2xf32>
    %79 = vector.shape_cast %78 : vector<1x2x2xf32> to vector<2x2xf32>
    %cst_69 = arith.constant dense<0.000000e+00> : vector<2x256xf32>
    %80 = tpu.matmul %79, %77, %cst_69 {dimension_numbers = #tpu.dot_dimension_numbers<[1], [0], [0], [1], [0, 0, 1, 1], [], []>} : vector<2x2xf32>, vector<2x256xf32>, vector<2x256xf32> -> vector<2x256xf32>
    %81 = arith.addf %76, %80 : vector<2x256xf32>
    %c4_70 = arith.constant 4 : index
    %c0_71 = arith.constant 0 : index
    %82 = vector.load %arg7[%c4_70, %c0_71] : memref<10x1xf32, #tpu.memory_space<vmem>>, vector<2x1xf32>
    %83 = vector.broadcast %82 : vector<2x1xf32> to vector<2x256xf32>
    %84 = arith.mulf %81, %83 : vector<2x256xf32>
    %c4_72 = arith.constant 4 : index
    %c0_73 = arith.constant 0 : index
    %85 = vector.load %arg8[%c4_72, %c0_73] : memref<10x1xf32, #tpu.memory_space<vmem>>, vector<2x1xf32>
    %86 = vector.broadcast %85 : vector<2x1xf32> to vector<2x256xf32>
    %87 = arith.addf %84, %86 : vector<2x256xf32>
    %c16 = arith.constant 16 : index
    %c128_74 = arith.constant 128 : index
    %88 = vector.load %arg10[%c16, %c128_74] : memref<24x448xf32, #tpu.memory_space<vmem>>, vector<2x256xf32>
    %89 = arith.addf %87, %88 : vector<2x256xf32>
    %c0_75 = arith.constant 0 : index
    %c4_76 = arith.constant 4 : index
    %c0_77 = arith.constant 0 : index
    %90 = vector.load %arg9[%c0_75, %c4_76, %c0_77] : memref<1x12x256xf32, #tpu.memory_space<vmem>>, vector<1x2x256xf32>
    %91 = vector.shape_cast %90 : vector<1x2x256xf32> to vector<2x256xf32>
    %92 = vector.shape_cast %89 : vector<2x256xf32> to vector<1x2x256xf32>
    tpu.vector_store %arg9[%c0_75, %c4_76, %c0_77], %92 {strides = array<i32>} : memref<1x12x256xf32, #tpu.memory_space<vmem>>, vector<1x2x256xf32>,
    %c6_78 = arith.constant 6 : index
    %c64_79 = arith.constant 64 : index
    %93 = vector.load %arg10[%c6_78, %c64_79] : memref<24x448xf32, #tpu.memory_space<vmem>>, vector<2x256xf32>
    %c9 = arith.constant 9 : index
    %c0_80 = arith.constant 0 : index
    %c0_81 = arith.constant 0 : index
    %94 = vector.load %arg6[%c9, %c0_80, %c0_81] : memref<12x2x2xf32, #tpu.memory_space<vmem>>, vector<1x2x2xf32>
    %95 = vector.shape_cast %94 : vector<1x2x2xf32> to vector<2x2xf32>
    %cst_82 = arith.constant dense<0.000000e+00> : vector<2x256xf32>
    %96 = tpu.matmul %95, %93, %cst_82 {dimension_numbers = #tpu.dot_dimension_numbers<[1], [0], [0], [1], [0, 0, 1, 1], [], []>} : vector<2x2xf32>, vector<2x256xf32>, vector<2x256xf32> -> vector<2x256xf32>
    %c6_83 = arith.constant 6 : index
    %c128_84 = arith.constant 128 : index
    %97 = vector.load %arg10[%c6_83, %c128_84] : memref<24x448xf32, #tpu.memory_space<vmem>>, vector<2x256xf32>
    %c10 = arith.constant 10 : index
    %c0_85 = arith.constant 0 : index
    %c0_86 = arith.constant 0 : index
    %98 = vector.load %arg6[%c10, %c0_85, %c0_86] : memref<12x2x2xf32, #tpu.memory_space<vmem>>, vector<1x2x2xf32>
    %99 = vector.shape_cast %98 : vector<1x2x2xf32> to vector<2x2xf32>
    %cst_87 = arith.constant dense<0.000000e+00> : vector<2x256xf32>
    %100 = tpu.matmul %99, %97, %cst_87 {dimension_numbers = #tpu.dot_dimension_numbers<[1], [0], [0], [1], [0, 0, 1, 1], [], []>} : vector<2x2xf32>, vector<2x256xf32>, vector<2x256xf32> -> vector<2x256xf32>
    %101 = arith.addf %96, %100 : vector<2x256xf32>
    %c6_88 = arith.constant 6 : index
    %c192 = arith.constant 192 : index
    %102 = vector.load %arg10[%c6_88, %c192] : memref<24x448xf32, #tpu.memory_space<vmem>>, vector<2x256xf32>
    %c11 = arith.constant 11 : index
    %c0_89 = arith.constant 0 : index
    %c0_90 = arith.constant 0 : index
    %103 = vector.load %arg6[%c11, %c0_89, %c0_90] : memref<12x2x2xf32, #tpu.memory_space<vmem>>, vector<1x2x2xf32>
    %104 = vector.shape_cast %103 : vector<1x2x2xf32> to vector<2x2xf32>
    %cst_91 = arith.constant dense<0.000000e+00> : vector<2x256xf32>
    %105 = tpu.matmul %104, %102, %cst_91 {dimension_numbers = #tpu.dot_dimension_numbers<[1], [0], [0], [1], [0, 0, 1, 1], [], []>} : vector<2x2xf32>, vector<2x256xf32>, vector<2x256xf32> -> vector<2x256xf32>
    %106 = arith.addf %101, %105 : vector<2x256xf32>
    %c6_92 = arith.constant 6 : index
    %c0_93 = arith.constant 0 : index
    %107 = vector.load %arg7[%c6_92, %c0_93] : memref<10x1xf32, #tpu.memory_space<vmem>>, vector<2x1xf32>
    %108 = vector.broadcast %107 : vector<2x1xf32> to vector<2x256xf32>
    %109 = arith.mulf %106, %108 : vector<2x256xf32>
    %c6_94 = arith.constant 6 : index
    %c0_95 = arith.constant 0 : index
    %110 = vector.load %arg8[%c6_94, %c0_95] : memref<10x1xf32, #tpu.memory_space<vmem>>, vector<2x1xf32>
    %111 = vector.broadcast %110 : vector<2x1xf32> to vector<2x256xf32>
    %112 = arith.addf %109, %111 : vector<2x256xf32>
    %c18 = arith.constant 18 : index
    %c128_96 = arith.constant 128 : index
    %113 = vector.load %arg10[%c18, %c128_96] : memref<24x448xf32, #tpu.memory_space<vmem>>, vector<2x256xf32>
    %114 = arith.addf %112, %113 : vector<2x256xf32>
    %c0_97 = arith.constant 0 : index
    %c6_98 = arith.constant 6 : index
    %c0_99 = arith.constant 0 : index
    %115 = vector.load %arg9[%c0_97, %c6_98, %c0_99] : memref<1x12x256xf32, #tpu.memory_space<vmem>>, vector<1x2x256xf32>
    %116 = vector.shape_cast %115 : vector<1x2x256xf32> to vector<2x256xf32>
    %117 = vector.shape_cast %114 : vector<2x256xf32> to vector<1x2x256xf32>
    tpu.vector_store %arg9[%c0_97, %c6_98, %c0_99], %117 {strides = array<i32>} : memref<1x12x256xf32, #tpu.memory_space<vmem>>, vector<1x2x256xf32>,
    %c8_100 = arith.constant 8 : index
    %c112_101 = arith.constant 112 : index
    %118 = vector.load %arg10[%c8_100, %c112_101] : memref<24x448xf32, #tpu.memory_space<vmem>>, vector<2x256xf32>
    %c8_102 = arith.constant 8 : index
    %c128_103 = arith.constant 128 : index
    %119 = vector.load %arg10[%c8_102, %c128_103] : memref<24x448xf32, #tpu.memory_space<vmem>>, vector<2x256xf32>
    %c8_104 = arith.constant 8 : index
    %c144_105 = arith.constant 144 : index
    %120 = vector.load %arg10[%c8_104, %c144_105] : memref<24x448xf32, #tpu.memory_space<vmem>>, vector<2x256xf32>
    %121 = arith.maximumf %118, %119 : vector<2x256xf32>
    %122 = arith.maximumf %121, %120 : vector<2x256xf32>
    %c8_106 = arith.constant 8 : index
    %c0_107 = arith.constant 0 : index
    %123 = vector.load %arg7[%c8_106, %c0_107] : memref<10x1xf32, #tpu.memory_space<vmem>>, vector<2x1xf32>
    %124 = vector.broadcast %123 : vector<2x1xf32> to vector<2x256xf32>
    %125 = arith.mulf %122, %124 : vector<2x256xf32>
    %c8_108 = arith.constant 8 : index
    %c0_109 = arith.constant 0 : index
    %126 = vector.load %arg8[%c8_108, %c0_109] : memref<10x1xf32, #tpu.memory_space<vmem>>, vector<2x1xf32>
    %127 = vector.broadcast %126 : vector<2x1xf32> to vector<2x256xf32>
    %128 = arith.addf %125, %127 : vector<2x256xf32>
    %c20 = arith.constant 20 : index
    %c128_110 = arith.constant 128 : index
    %129 = vector.load %arg10[%c20, %c128_110] : memref<24x448xf32, #tpu.memory_space<vmem>>, vector<2x256xf32>
    %130 = arith.addf %128, %129 : vector<2x256xf32>
    %c0_111 = arith.constant 0 : index
    %c8_112 = arith.constant 8 : index
    %c0_113 = arith.constant 0 : index
    %131 = vector.load %arg9[%c0_111, %c8_112, %c0_113] : memref<1x12x256xf32, #tpu.memory_space<vmem>>, vector<1x2x256xf32>
    %132 = vector.shape_cast %131 : vector<1x2x256xf32> to vector<2x256xf32>
    %133 = vector.shape_cast %130 : vector<2x256xf32> to vector<1x2x256xf32>
    tpu.vector_store %arg9[%c0_111, %c8_112, %c0_113], %133 {strides = array<i32>} : memref<1x12x256xf32, #tpu.memory_space<vmem>>, vector<1x2x256xf32>,
    %c10_114 = arith.constant 10 : index
    %c128_115 = arith.constant 128 : index
    %134 = vector.load %arg10[%c10_114, %c128_115] : memref<24x448xf32, #tpu.memory_space<vmem>>, vector<2x256xf32>
    %c22 = arith.constant 22 : index
    %c128_116 = arith.constant 128 : index
    %135 = vector.load %arg10[%c22, %c128_116] : memref<24x448xf32, #tpu.memory_space<vmem>>, vector<2x256xf32>
    %136 = arith.addf %134, %135 : vector<2x256xf32>
    %c0_117 = arith.constant 0 : index
    %c10_118 = arith.constant 10 : index
    %c0_119 = arith.constant 0 : index
    %137 = vector.load %arg9[%c0_117, %c10_118, %c0_119] : memref<1x12x256xf32, #tpu.memory_space<vmem>>, vector<1x2x256xf32>
    %138 = vector.shape_cast %137 : vector<1x2x256xf32> to vector<2x256xf32>
    %139 = vector.shape_cast %136 : vector<2x256xf32> to vector<1x2x256xf32>
    tpu.vector_store %arg9[%c0_117, %c10_118, %c0_119], %139 {strides = array<i32>} : memref<1x12x256xf32, #tpu.memory_space<vmem>>, vector<1x2x256xf32>,
    return
  }
  func.func @transform_0(%arg0: i32) -> (i32, i32, i32) {
    %c0_i32 = arith.constant 0 : i32
    %c0_i32_0 = arith.constant 0 : i32
    %c0_i32_1 = arith.constant 0 : i32
    return %arg0, %c0_i32, %c0_i32_0 : i32, i32, i32
  }
  func.func @transform_1(%arg0: i32) -> (i32, i32) {
    %c0_i32 = arith.constant 0 : i32
    %c0_i32_0 = arith.constant 0 : i32
    %c0_i32_1 = arith.constant 0 : i32
    return %c0_i32, %c0_i32_0 : i32, i32
  }
  func.func @transform_2(%arg0: i32) -> (i32, i32) {
    %c0_i32 = arith.constant 0 : i32
    %c0_i32_0 = arith.constant 0 : i32
    %c0_i32_1 = arith.constant 0 : i32
    return %c0_i32, %c0_i32_0 : i32, i32
  }
  func.func @transform_3(%arg0: i32) -> (i32, i32) {
    %c0_i32 = arith.constant 0 : i32
    %c0_i32_0 = arith.constant 0 : i32
    %c0_i32_1 = arith.constant 0 : i32
    return %c0_i32, %c0_i32_0 : i32, i32
  }
  func.func @transform_4(%arg0: i32) -> (i32, i32) {
    %c0_i32 = arith.constant 0 : i32
    %c0_i32_0 = arith.constant 0 : i32
    %c0_i32_1 = arith.constant 0 : i32
    return %c0_i32, %c0_i32_0 : i32, i32
  }
  func.func @transform_5(%arg0: i32) -> (i32, i32, i32) {
    %c0_i32 = arith.constant 0 : i32
    %c0_i32_0 = arith.constant 0 : i32
    %c0_i32_1 = arith.constant 0 : i32
    %c0_i32_2 = arith.constant 0 : i32
    return %c0_i32, %c0_i32_0, %c0_i32_1 : i32, i32, i32
  }
  func.func @transform_6(%arg0: i32) -> (i32, i32) {
    %c0_i32 = arith.constant 0 : i32
    %c0_i32_0 = arith.constant 0 : i32
    %c0_i32_1 = arith.constant 0 : i32
    return %c0_i32, %c0_i32_0 : i32, i32
  }
  func.func @transform_7(%arg0: i32) -> (i32, i32) {
    %c0_i32 = arith.constant 0 : i32
    %c0_i32_0 = arith.constant 0 : i32
    %c0_i32_1 = arith.constant 0 : i32
    return %c0_i32, %c0_i32_0 : i32, i32
  }
  func.func @transform_8(%arg0: i32) -> (i32, i32, i32) {
    %c0_i32 = arith.constant 0 : i32
    %c0_i32_0 = arith.constant 0 : i32
    %c0_i32_1 = arith.constant 0 : i32
    return %arg0, %c0_i32, %c0_i32_0 : i32, i32, i32
  }
}

</mosaic_0001>

<bundles_post_ra>
// kernel: _lambda_.1
= control target key start
LH: loop header
LB: loop body
LE: loop exit
PB: predicated region body
PF: predicated region fallthrough
CT: control target
= control target key end

     0   :  { %s2029_s27 = smov 0   ;;  %s2304_s0 = inlined_call_operand.vmem [shape: f32[2,4,256], index: 0, kind: input, shape index: {}]   ;;  %s2305_s1 = inlined_call_operand.vmem [shape: f32[24,4], index: 1, kind: input, shape index: {}]   ;;  %s2306_s2 = inlined_call_operand.vmem [shape: f32[24,1], index: 2, kind: input, shape index: {}]   ;;  %s2307_s3 = inlined_call_operand.vmem [shape: f32[24,1], index: 3, kind: input, shape index: {}]   ;;  %s2308_s4 = inlined_call_operand.vmem [shape: f32[24,1], index: 4, kind: input, shape index: {}]   ;;  %s2309_s5 = inlined_call_operand.vmem [shape: f32[12,2,2], index: 5, kind: input, shape index: {}]   ;;  %s2310_s6 = inlined_call_operand.vmem [shape: f32[10,1], index: 6, kind: input, shape index: {}]   ;;  %s2311_s7 = inlined_call_operand.vmem [shape: f32[10,1], index: 7, kind: input, shape index: {}]   ;;  %s2312_s8 = inlined_call_operand.vmem [shape: f32[2,12,256], index: 8, kind: output, shape index: {}]  }
   0x1 LB: > { %s1882_s28 = sadd.s32 4294967295, %s1973_s27   ;;  %p1886_p0 = scmp.ge.s32.totalorder %s1973_s27, 1  ;;  %s1973_s27 = sphi %s2029_s27, %s18_s27  }
   0x2   : > { %p262_p1 = scmp.lt.s32.totalorder %s1973_s27, 3 }
   0x4   : > { %p263_p2 = pnand %p1886_p0, %p262_p1 }
   0x5   : > { %p296_p3 = scmp.lt.s32.totalorder (!%p263_p2), %s1882_s28, 1  ;;  %s1977_s19 = smov (!%p263_p2), 16  }
   0x6   : > { %266 = sbr.rel (%p263_p2) target bundleno = 671 (0x29f), region = 52  ;;  %s1978_s24 = smov (!%p263_p2), 112  }
   0x7   : > { %s1979_s25 = smov (!%p263_p2), 32   ;;  %s1980_s26 = smov (!%p263_p2), 96  }
   0x8   : > { %s1981_s29 = smov (!%p263_p2), 48   ;;  %s1982_s10 = smov (!%p263_p2), 80  }
   0xb   : > { %v1975_v0 = vmov 0.0   ;;  %v1976_v1 = vmov 0   ;;  %v410_v2 = vld [vmem:[%s2306_s2] sm:$0xff]  ;;  %vm488_vm0 = vcmask 1048064   ;;  %s2314_s28 = smov (!%p296_p3, %s1882_s28), 1  ;;  %vm322_vm1 = vcmask 1043456  }
   0xc   : > { %391 = vmatprep.mubr.f32.mxu0 %v1975_v0  ;;  %1964 = vset.pattern.permute.xlu0 %v1976_v1  ;;  %v458_v3 = vld [vmem:[%s2308_s4] sm:$0xff]  ;;  %489 = vst.msk [vmem:[#allocation2] sm:$0xff] %vm488_vm0, %v1975_v0  ;;  %s1945_s13 = sshll.u32 %s2314_s28, 3  ;;  %vm312_vm2 = vcmask 31744   ;;  %v308_v9 = vld [vmem:[%s2305_s1 + $0x8] sm:$0xff]  ;;  %v309_v10 = vld [vmem:[%s2305_s1 + $0x10] sm:$0xff] }
   0xd   : > { %415 = vperm.xlu0 %1964, %v410_v2   ;;  %1965 = vset.pattern.permute.xlu1 %v1976_v1  ;;  %v434_v4 = vld [vmem:[%s2307_s3] sm:$0xff]  ;;  %s300_s16 = scalar_lea.vmem %s2304_s0, %s1945_s13  ;;  %vm492_vm3 = vcmask 523264   ;;  %vm512_vm4 = vcmask 1041408   ;;  %vm508_vm5 = vcmask 15360   ;;  %v1908_v45 = vld [vmem:[%s2309_s5 + $0x8] sm:$0x3] }
   0xe   : > { %463 = vperm.xlu1 %1965, %v458_v3   ;;  %583 = vmatprep.mubr.f32.mxu1 %v1975_v0  ;;  %v306_v5 = vld [vmem:[%s300_s16] sm:$0xff]  ;;  %493 = vst.msk [vmem:[#allocation2 + $0x18] sm:$0xff] %vm492_vm3, %v1975_v0  ;;  %s1983_s13 = smov 64   ;;  %v411_v58 = vld [vmem:[%s2306_s2 + $0x8] sm:$0xff]  ;;  %v436_v1 = vld [vmem:[%s2307_s3 + $0x10] sm:$0xff]  ;;  %vm494_vm6 = vcmask 517120  }
   0xf   : > { %v311_v6 = vcombine.high %v306_v5, %v306_v5  ;;  %v307_v7 = vld [vmem:[%s2305_s1] sm:$0xff]  ;;  %v459_v61 = vld [vmem:[%s2308_s4 + $0x8] sm:$0xff]  ;;  %495 = vst.msk [vmem:[#allocation2 + $0x38] sm:$0x3] %vm494_vm6, %v1975_v0  ;;  %vm597_vm7 = vcmask 130048   ;;  %vm692_vm8 = vcmask 916480  }
  0x10   : > { %v1896_v40 = vld [vmem:[%s2309_s5 + $0x2] sm:$0x3]  ;;  %vm900_vm9 = vcmask 261120   ;;  %vm998_vm10 = vcmask 785408   ;;  %vm1212_vm11 = vcmask 392192   ;;  %vm1310_vm12 = vcmask 654336  }
  0x11   : > { %439 = vperm.xlu0 %1964, %v434_v4   ;;  %1891 = vmatprep.subr.msk.mxu0 %vm322_vm1, %v311_v6  ;;  %v1763_v4 = vld [vmem:[%s2310_s6 + $0x8] sm:$0x3]  ;;  %vm490_vm13 = vcmask 1041920   ;;  %s1946_s14 = sshll.u32 %s2314_s28, 5 }
  0x12   : > { %1892 = vmatpush1.msk.msra.mxu0 %vm322_vm1, %v306_v5  ;;  %491 = vst.msk [vmem:[#allocation2 + $0x20] sm:$0x3] %vm490_vm13, %v1975_v0  ;;  %s2247_s20 = scalar_lea.vmem %s2312_s8, %s1946_s14 }
  0x13   : > { %v502_v8 = vld [vmem:[#allocation2] sm:$0x3]  ;;  %1893 = vmatmul.mubr.msk.f32.vlgmr.msra.gmra.mxu0 %vm312_vm2, %v307_v7  ;;  %v803_v12 = vld [vmem:[#allocation2] sm:$0xc]  ;;  %v1115_v16 = vld [vmem:[#allocation2] sm:$0x30] }
  0x14   : > { %591 = vrot.lane.b32.xlu1 %v502_v8, %s1977_s19  ;;  %397 = vmatprep.mubr.f32.mxu0 %v1975_v0  ;;  %v893_v13 = vrot.slane %v803_v12, 2  ;;  %v1205_v17 = vrot.slane %v1115_v16, 4  ;;  %v1421_v41 = vld [vmem:[#allocation2] sm:$0xc0]  ;;  %v435_v8 = vld [vmem:[%s2307_s3 + $0x8] sm:$0xff] }
  0x15   : > { %v680_v11 = vld [vmem:[#allocation2 + $0x18] sm:$0x3]  ;;  %v983_v14 = vld [vmem:[#allocation2 + $0x18] sm:$0xc]  ;;  %v1295_v31 = vld [vmem:[#allocation2 + $0x18] sm:$0x30] }
  0x16   : > { %v991_v15 = vrot.slane %v983_v14, 2  ;;  %v1303_v34 = vrot.slane %v1295_v31, 4  ;;  %v1511_v43 = vrot.slane %v1421_v41, 6  ;;  %v1600_v52 = vld [vmem:[#allocation2 + $0x18] sm:$0xc0] }
  0x17   : > { %1894 = vmatmul.mubr.msk.f32.gmra.mxu0 %vm312_vm2, %v308_v9  ;;  %v1608_v54 = vrot.slane %v1600_v52, 6  ;;  %v412_v9 = vld [vmem:[%s2306_s2 + $0x10] sm:$0xff] }
  0x18   : > { %403 = vmatprep.mubr.f32.mxu0 %v1975_v0  ;;  %690 = vrot.lane.b32.xlu1 %v680_v11, %s1978_s24 }
  0x1b   : > { %1895 = vmatmul.mubr.msk.f32.gmra.mxu0 %vm312_vm2, %v309_v10  ;;  %v460_v10 = vld [vmem:[%s2308_s4 + $0x10] sm:$0xff] }
  0x1c   : > { %885 = vmatprep.mubr.f32.mxu0 %v1975_v0  ;;  %894 = vrot.lane.b32.xlu1 %v893_v13, %s1979_s25 }
  0x20   : > { %996 = vrot.lane.b32.xlu1 %v991_v15, %s1980_s26 }
  0x24   : > { %1206 = vrot.lane.b32.xlu1 %v1205_v17, %s1981_s29 }
  0x88   : > { %v416_v18 = vpop.permute.xlu0 %415 }
  0x89   : > { %v464_v21 = vpop.permute.xlu1 %463 }
  0x8c   : > { %v440_v22 = vpop.permute.xlu0 %439 }
  0x8d   : > { %v592_v11 = vpop.permute.xlu1 %591 }
  0x91   : > { %v691_v12 = vpop.permute.xlu1 %690 }
  0x95   : > { %v895_v13 = vpop.permute.xlu1 %894 }
  0x99   : > { %v997_v14 = vpop.permute.xlu1 %996 }
  0x9d   : > { %v1207_v15 = vpop.permute.xlu1 %1206 }
  0xd3   : > { %v393_v19 = vpop.f32.mrf.mxu0 }
  0xd4   : > { %v428_v20 = vmul.f32 %v416_v18, %v393_v19 }
  0xd5   : > { %v395_v23 = vpop.f32.mrf.mxu0 }
  0xd6   : > { %v452_v24 = vadd.f32 %v440_v22, %v428_v20  ;;  %v429_v25 = vmul.f32 %v416_v18, %v395_v23  ;;  %v505_v20 = vld [vmem:[%s2309_s5] sm:$0x3] }
  0xd8   : > { %v453_v26 = vadd.f32 %v440_v22, %v429_v25  ;;  %v476_v27 = vmul.f32 %v464_v21, %v452_v24 }
  0xda   : > { %v477_v28 = vmul.f32 %v464_v21, %v453_v26  ;;  %v482_v29 = vmax.f32 %v452_v24, %v476_v27 }
  0xdc   : > { %v483_v30 = vmax.f32 %v453_v26, %v477_v28  ;;  %496 = vst [vmem:[#allocation2 + $0x8] sm:$0xff] %v482_v29  ;;  %v1903_v26 = vld [vmem:[%s2309_s5 + $0x4] sm:$0x3] }
  0xde   : > { %497 = vst [vmem:[#allocation2 + $0x10] sm:$0xff] %v483_v30 }
  0xe3   : > { %v678_v32 = vld [vmem:[#allocation2 + $0x8] sm:$0x3]  ;;  %v804_v35 = vld [vmem:[#allocation2 + $0x8] sm:$0xc]  ;;  %v2092_v47 = vld [vmem:[#allocation2 + $0x8] sm:$0x30] }
  0xe4   : > { %v503_v33 = vld [vmem:[#allocation2 + $0x8] sm:$0x3]  ;;  %686 = vrot.lane.b32.xlu0 %v678_v32, %s1978_s24  ;;  %v812_v39 = vrot.slane %v804_v35, 2  ;;  %v981_v44 = vld [vmem:[#allocation2 + $0x8] sm:$0xc]  ;;  %v1124_v49 = vrot.slane %v2092_v47, 4 }
  0xe5   : > { %593 = vrot.lane.b32.xlu1 %v503_v33, %s1977_s19  ;;  %v504_v36 = vld [vmem:[#allocation2 + $0x10] sm:$0x3]  ;;  %v805_v37 = vld [vmem:[#allocation2 + $0x10] sm:$0xc]  ;;  %v989_v46 = vrot.slane %v981_v44, 2 }
  0xe6   : > { %1897 = vmatprep.subr.msk.mxu1 %vm512_vm4, %v504_v36  ;;  %v813_v38 = vrot.slane %v805_v37, 2  ;;  %v679_v42 = vld [vmem:[#allocation2 + $0x10] sm:$0x3]  ;;  %v1293_v48 = vld [vmem:[#allocation2 + $0x8] sm:$0x30] }
  0xe7   : > { %1898 = vmatpush1.msk.msra.mxu1 %vm512_vm4, %v503_v33  ;;  %v1301_v50 = vrot.slane %v1293_v48, 4  ;;  %v2099_v51 = vld [vmem:[#allocation2 + $0x8] sm:$0xc0]  ;;  %v982_v55 = vld [vmem:[#allocation2 + $0x10] sm:$0xc] }
  0xe8   : > { %1909 = vmatprep.subr.msk.mxu0 %vm512_vm4, %v813_v38  ;;  %595 = vrot.lane.b32.xlu0 %v504_v36, %s1977_s19  ;;  %v1430_v53 = vrot.slane %v2099_v51, 6  ;;  %v990_v56 = vrot.slane %v982_v55, 2  ;;  %v2111_v57 = vld [vmem:[#allocation2 + $0x10] sm:$0x30]  ;;  %v2124_v63 = vld [vmem:[#allocation2 + $0x10] sm:$0xc0] }
  0xe9   : > { %1308 = vrot.lane.b32.xlu1 %v1303_v34, %s1982_s10  ;;  %1910 = vmatpush1.msk.msra.mxu0 %vm512_vm4, %v812_v39  ;;  %v1125_v59 = vrot.slane %v2111_v57, 4  ;;  %v1294_v60 = vld [vmem:[#allocation2 + $0x10] sm:$0x30]  ;;  %v1431_v2 = vrot.slane %v2124_v63, 6  ;;  %v1599_v3 = vld [vmem:[#allocation2 + $0x10] sm:$0xc0] }
  0xea   : > { %1899 = vmatmul.mubr.msk.f32.vlgmr.msra.gmra.mxu1 %vm508_vm5, %v1896_v40  ;;  %1911 = vmatmul.mubr.msk.f32.vlgmr.msra.gmra.mxu0 %vm508_vm5, %v1908_v45  ;;  %v1302_v62 = vrot.slane %v1294_v60, 4  ;;  %v1607_v5 = vrot.slane %v1599_v3, 6  ;;  %v1598_v6 = vld [vmem:[#allocation2 + $0x8] sm:$0xc0]  ;;  %v1907_v33 = vld [vmem:[%s2309_s5 + $0x6] sm:$0x3] }
  0xeb   : > { %671 = vmatprep.mubr.f32.mxu1 %v1975_v0  ;;  %1072 = vmatprep.mubr.f32.mxu0 %v1975_v0  ;;  %v1606_v7 = vrot.slane %v1598_v6, 6  ;;  %v1927_v48 = vld [vmem:[%s2309_s5 + $0x10] sm:$0x3] }
  0xec   : > { %688 = vrot.lane.b32.xlu0 %v679_v42, %s1978_s24 }
  0xed   : > { %896 = vrot.lane.b32.xlu1 %v812_v39, %s1979_s25  ;;  %v1920_v39 = vld [vmem:[%s2309_s5 + $0xe] sm:$0x3] }
  0xf0   : > { %992 = vrot.lane.b32.xlu0 %v989_v46, %s1980_s26 }
  0xf1   : > { %1512 = vrot.lane.b32.xlu1 %v1511_v43, %s1983_s13  ;;  %v1919_v43 = vld [vmem:[%s2309_s5 + $0xc] sm:$0x3] }
  0xf4   : > { %1304 = vrot.lane.b32.xlu0 %v1301_v50, %s1982_s10 }
  0xf5   : > { %1208 = vrot.lane.b32.xlu1 %v1124_v49, %s1981_s29 }
  0xf8   : > { %898 = vrot.lane.b32.xlu0 %v813_v38, %s1979_s25  ;;  %v1915_v38 = vld [vmem:[%s2309_s5 + $0xa] sm:$0x3] }
  0xf9   : > { %1514 = vrot.lane.b32.xlu1 %v1430_v53, %s1983_s13 }
  0xfc   : > { %994 = vrot.lane.b32.xlu0 %v990_v56, %s1980_s26 }
  0xfd   : > { %1613 = vrot.lane.b32.xlu1 %v1608_v54, %s1983_s13 }
 0x100   : > { %1210 = vrot.lane.b32.xlu0 %v1125_v59, %s1981_s29 }
 0x101   : > { %420 = vperm.xlu1 %1965, %v411_v58  }
 0x104   : > { %1306 = vrot.lane.b32.xlu0 %v1302_v62, %s1982_s10 }
 0x105   : > { %468 = vperm.xlu1 %1965, %v459_v61   ;;  %v399_v61 = vpop.f32.mrf.mxu0 }
 0x107   : > { %v401_v63 = vpop.f32.mrf.mxu0 }
 0x108   : > { %1516 = vrot.lane.b32.xlu0 %v1431_v2, %s1983_s13 }
 0x109   : > { %449 = vperm.xlu1 %1965, %v436_v1   ;;  %v405_v1 = vpop.f32.mrf.mxu0 }
 0x10c   : > { %1611 = vrot.lane.b32.xlu0 %v1607_v5, %s1983_s13 }
 0x10d   : > { %1766 = vperm.xlu1 %1965, %v1763_v4  }
 0x110   : > { %1609 = vrot.lane.b32.xlu0 %v1606_v7, %s1983_s13 }
 0x114   : > { %444 = vperm.xlu0 %1964, %v435_v8   ;;  %v407_v8 = vpop.f32.mrf.mxu0 }
 0x118   : > { %425 = vperm.xlu0 %1964, %v412_v9  }
 0x11c   : > { %473 = vperm.xlu0 %1964, %v460_v10  }
 0x156   : > { %v687_v16 = vpop.permute.xlu0 %686 }
 0x157   : > { %v594_v17 = vpop.permute.xlu1 %593 }
 0x158   : > { %v598_v21 = vsel %vm597_vm7, %v592_v11, %v594_v17 }
 0x15a   : > { %v596_v18 = vpop.permute.xlu0 %595 }
 0x15b   : > { %v599_v19 = vsel %vm597_vm7, %v594_v17, %v596_v18  ;;  %v1309_v23 = vpop.permute.xlu1 %1308 }
 0x15c   : > { %1900 = vmatprep.subr.msk.mxu1 %vm512_vm4, %v599_v19 }
 0x15d   : > { %1901 = vmatpush1.msk.msra.mxu1 %vm512_vm4, %v598_v21 }
 0x15e   : > { %v689_v22 = vpop.permute.xlu0 %688  ;;  %1902 = vmatmul.mubr.msk.f32.vlgmr.msra.gmra.mxu1 %vm508_vm5, %v505_v20 }
 0x15f   : > { %v693_v24 = vsel %vm692_vm8, %v687_v16, %v689_v22  ;;  %v694_v25 = vsel %vm692_vm8, %v689_v22, %v691_v12  ;;  %766 = vmatprep.mubr.f32.mxu1 %v1975_v0  ;;  %v897_v28 = vpop.permute.xlu1 %896 }
 0x160   : > { %1904 = vmatprep.subr.msk.mxu1 %vm512_vm4, %v694_v25  ;;  %v901_v34 = vsel %vm900_vm9, %v895_v13, %v897_v28  ;;  %v1772_v25 = vld [vmem:[%s2311_s7 + $0x8] sm:$0x3] }
 0x161   : > { %1905 = vmatpush1.msk.msra.mxu1 %vm512_vm4, %v693_v24 }
 0x162   : > { %v993_v27 = vpop.permute.xlu0 %992  ;;  %1906 = vmatmul.mubr.msk.f32.vlgmr.msra.gmra.mxu1 %vm508_vm5, %v1903_v26 }
 0x163   : > { %974 = vmatprep.mubr.f32.mxu1 %v1975_v0  ;;  %v1513_v31 = vpop.permute.xlu1 %1512 }
 0x166   : > { %v1305_v29 = vpop.permute.xlu0 %1304 }
 0x167   : > { %v1209_v40 = vpop.permute.xlu1 %1208 }
 0x168   : > { %v1213_v44 = vsel %vm1212_vm11, %v1207_v15, %v1209_v40 }
 0x16a   : > { %v899_v30 = vpop.permute.xlu0 %898 }
 0x16b   : > { %v902_v32 = vsel %vm900_vm9, %v897_v28, %v899_v30  ;;  %v1515_v50 = vpop.permute.xlu1 %1514  ;;  %v1734_v28 = vld [vmem:[#allocation2 + $0x38] sm:$0x3] }
 0x16c   : > { %1912 = vmatprep.subr.msk.mxu1 %vm512_vm4, %v902_v32  ;;  %v1518_v54 = vsel %vm492_vm3, %v1513_v31, %v1515_v50 }
 0x16d   : > { %1913 = vmatpush1.msk.msra.mxu1 %vm512_vm4, %v901_v34 }
 0x16e   : > { %v995_v35 = vpop.permute.xlu0 %994  ;;  %1921 = vmatprep.subr.msk.mxu1 %vm512_vm4, %v1125_v59  ;;  %1914 = vmatmul.mubr.msk.f32.vlgmr.msra.gmra.mxu1 %vm508_vm5, %v1907_v33  ;;  %v1939_v59 = vld [vmem:[%s2309_s5 + $0x16] sm:$0x3] }
 0x16f   : > { %v999_v36 = vsel %vm998_vm10, %v993_v27, %v995_v35  ;;  %v1000_v37 = vsel %vm998_vm10, %v995_v35, %v997_v14  ;;  %1922 = vmatpush1.msk.msra.mxu1 %vm512_vm4, %v1124_v49  ;;  %1197 = vmatprep.mubr.f32.mxu1 %v1975_v0  ;;  %v1932_v49 = vld [vmem:[%s2309_s5 + $0x14] sm:$0x3]  ;;  %v1614_v55 = vpop.permute.xlu1 %1613 }
 0x170   : > { %1916 = vmatprep.subr.msk.mxu0 %vm512_vm4, %v1000_v37 }
 0x171   : > { %1917 = vmatpush1.msk.msra.mxu0 %vm512_vm4, %v999_v36 }
 0x172   : > { %1918 = vmatmul.mubr.msk.f32.vlgmr.msra.gmra.mxu0 %vm508_vm5, %v1915_v38  ;;  %v1211_v41 = vpop.permute.xlu0 %1210  ;;  %1923 = vmatmul.mubr.msk.f32.vlgmr.msra.gmra.mxu1 %vm508_vm5, %v1920_v39  ;;  %v1081_v39 = vld [vmem:[%s2310_s6 + $0x2] sm:$0x3] }
 0x173   : > { %v1214_v42 = vsel %vm1212_vm11, %v1209_v40, %v1211_v41  ;;  %1286 = vmatprep.mubr.f32.mxu0 %v1975_v0  ;;  %1384 = vmatprep.mubr.f32.mxu1 %v1975_v0  ;;  %v1393_v40 = vld [vmem:[%s2310_s6 + $0x4] sm:$0x3]  ;;  %v1697_v41 = vld [vmem:[%s2310_s6 + $0x6] sm:$0x3] }
 0x174   : > { %1924 = vmatprep.subr.msk.mxu0 %vm512_vm4, %v1214_v42  ;;  %v775_v42 = vld [vmem:[%s2310_s6] sm:$0x3] }
 0x175   : > { %1925 = vmatpush1.msk.msra.mxu0 %vm512_vm4, %v1213_v44  ;;  %v1401_v44 = vld [vmem:[%s2311_s7 + $0x4] sm:$0x3] }
 0x176   : > { %1933 = vmatprep.subr.msk.mxu0 %vm512_vm4, %v1431_v2  ;;  %v1307_v45 = vpop.permute.xlu0 %1306  ;;  %1926 = vmatmul.mubr.msk.f32.vlgmr.msra.gmra.mxu0 %vm508_vm5, %v1919_v43  ;;  %v1089_v43 = vld [vmem:[%s2311_s7 + $0x2] sm:$0x3] }
 0x177   : > { %v1311_v46 = vsel %vm1310_vm12, %v1305_v29, %v1307_v45  ;;  %v1312_v47 = vsel %vm1310_vm12, %v1307_v45, %v1309_v23  ;;  %1934 = vmatpush1.msk.msra.mxu0 %vm512_vm4, %v1430_v53  ;;  %1503 = vmatprep.mubr.f32.mxu0 %v1975_v0  ;;  %v1931_v53 = vld [vmem:[%s2309_s5 + $0x12] sm:$0x3]  ;;  %v1705_v45 = vld [vmem:[%s2311_s7 + $0x6] sm:$0x3] }
 0x178   : > { %1928 = vmatprep.subr.msk.mxu1 %vm512_vm4, %v1312_v47 }
 0x179   : > { %1929 = vmatpush1.msk.msra.mxu1 %vm512_vm4, %v1311_v46  ;;  %v783_v46 = vld [vmem:[%s2311_s7] sm:$0x3] }
 0x17a   : > { %v1517_v52 = vpop.permute.xlu0 %1516  ;;  %1930 = vmatmul.mubr.msk.f32.vlgmr.msra.gmra.mxu1 %vm508_vm5, %v1927_v48  ;;  %1935 = vmatmul.mubr.msk.f32.vlgmr.msra.gmra.mxu0 %vm508_vm5, %v1932_v49 }
 0x17b   : > { %v1519_v51 = vsel %vm492_vm3, %v1515_v50, %v1517_v52  ;;  %1591 = vmatprep.mubr.f32.mxu1 %v1975_v0  ;;  %1688 = vmatprep.mubr.f32.mxu0 %v1975_v0  ;;  %v1731_v50 = vld [vmem:[#allocation2 + $0x20] sm:$0x3] }
 0x17c   : > { %1936 = vmatprep.subr.msk.mxu1 %vm512_vm4, %v1519_v51  ;;  %v421_v62 = vpop.permute.xlu1 %420 }
 0x17d   : > { %1937 = vmatpush1.msk.msra.mxu1 %vm512_vm4, %v1518_v54  ;;  %v430_v2 = vmul.f32 %v421_v62, %v399_v61  ;;  %v431_v3 = vmul.f32 %v421_v62, %v401_v63 }
 0x17e   : > { %v1612_v56 = vpop.permute.xlu0 %1611  ;;  %1938 = vmatmul.mubr.msk.f32.vlgmr.msra.gmra.mxu1 %vm508_vm5, %v1931_v53 }
 0x17f   : > { %v1616_v57 = vsel %vm492_vm3, %v1612_v56, %v1614_v55 }
 0x180   : > { %1940 = vmatprep.subr.msk.mxu0 %vm512_vm4, %v1616_v57  ;;  %v469_v4 = vpop.permute.xlu1 %468 }
 0x182   : > { %v1610_v58 = vpop.permute.xlu0 %1609 }
 0x183   : > { %v1615_v60 = vsel %vm492_vm3, %v1610_v58, %v1612_v56 }
 0x184   : > { %1941 = vmatpush1.msk.msra.mxu0 %vm512_vm4, %v1615_v60  ;;  %v450_v16 = vpop.permute.xlu1 %449 }
 0x185   : > { %1942 = vmatmul.mubr.msk.f32.vlgmr.msra.gmra.mxu0 %vm508_vm5, %v1939_v59 }
 0x188   : > { %v1767_v48 = vpop.permute.xlu1 %1766 }
 0x18f   : > { %v445_v5 = vpop.permute.xlu0 %444 }
 0x190   : > { %v454_v6 = vadd.f32 %v445_v5, %v430_v2  ;;  %v455_v7 = vadd.f32 %v445_v5, %v431_v3 }
 0x192   : > { %v478_v9 = vmul.f32 %v469_v4, %v454_v6  ;;  %v479_v10 = vmul.f32 %v469_v4, %v455_v7 }
 0x193   : > { %v426_v11 = vpop.permute.xlu0 %425 }
 0x194   : > { %v484_v12 = vmax.f32 %v454_v6, %v478_v9  ;;  %v485_v13 = vmax.f32 %v455_v7, %v479_v10  ;;  %v432_v14 = vmul.f32 %v426_v11, %v405_v1  ;;  %v433_v15 = vmul.f32 %v426_v11, %v407_v8 }
 0x196   : > { %498 = vst [vmem:[#allocation2 + $0x28] sm:$0xff] %v484_v12  ;;  %499 = vst [vmem:[#allocation2 + $0x30] sm:$0xff] %v485_v13  ;;  %v457_v17 = vadd.f32 %v450_v16, %v433_v15  ;;  %v456_v18 = vadd.f32 %v450_v16, %v432_v14 }
 0x197   : > { %v474_v19 = vpop.permute.xlu0 %473 }
 0x198   : > { %v480_v20 = vmul.f32 %v474_v19, %v456_v18  ;;  %v481_v21 = vmul.f32 %v474_v19, %v457_v17 }
 0x19a   : > { %v486_v0 = vmax.f32 %v456_v18, %v480_v20  ;;  %v487_v22 = vmax.f32 %v457_v17, %v481_v21 }
 0x19c   : > { %500 = vst [vmem:[#allocation2 + $0x48] sm:$0xff] %v486_v0  ;;  %501 = vst [vmem:[#allocation2 + $0x50] sm:$0xff] %v487_v22 }
 0x19d   : > { %v1732_v23 = vld [vmem:[#allocation2 + $0x28] sm:$0x3]  ;;  %v1733_v24 = vld [vmem:[#allocation2 + $0x30] sm:$0x3]  ;;  %v1813_v29 = vld [vmem:[#allocation2 + $0x28] sm:$0xc] }
 0x19e   : > { %1749 = vrot.lane.b32.xlu0 %v1732_v23, %s1980_s26  ;;  %1737 = vrot.lane.b32.xlu1 %v1732_v23, %s1978_s24  ;;  %v1814_v32 = vld [vmem:[#allocation2 + $0x30] sm:$0xc] }
 0x1a2   : > { %1751 = vrot.lane.b32.xlu1 %v1733_v24, %s1980_s26  ;;  %1739 = vrot.lane.b32.xlu0 %v1733_v24, %s1978_s24 }
 0x1a3   : > { %v1815_v26 = vld [vmem:[#allocation2 + $0x48] sm:$0xc0]  ;;  %v1816_v27 = vld [vmem:[#allocation2 + $0x50] sm:$0xc0]  ;;  %v1781_v33 = vld [vmem:[#allocation2 + $0x48] sm:$0x30] }
 0x1a4   : > { %v1819_v30 = vrot.slane %v1815_v26, 4  ;;  %v1820_v31 = vrot.slane %v1816_v27, 4  ;;  %v1782_v34 = vld [vmem:[#allocation2 + $0x50] sm:$0x30]  ;;  %v1785_v37 = vrot.slane %v1781_v33, 4 }
 0x1a5   : > { %v1786_v38 = vrot.slane %v1782_v34, 4 }
 0x1a6   : > { %v1823_v35 = vadd.f32 %v1819_v30, %v1813_v29  ;;  %v1824_v36 = vadd.f32 %v1820_v31, %v1814_v32  ;;  %1775 = vperm.xlu1 %1965, %v1772_v25   ;;  %1753 = vrot.lane.b32.xlu0 %v1734_v28, %s1980_s26 }
 0x1a8   : > { %1825 = vst [vmem:[%s2247_s20 + $0x10] sm:$0xc] %v1823_v35  ;;  %1826 = vst [vmem:[%s2247_s20 + $0x18] sm:$0xc] %v1824_v36  ;;  %v791_v36 = vld [vmem:[#allocation2 + $0x28] sm:$0x30] }
 0x1aa   : > { %1787 = vrot.lane.b32.xlu0 %v1785_v37, %s1978_s24  ;;  %1789 = vrot.lane.b32.xlu1 %v1786_v38, %s1978_s24  ;;  %v585_v54 = vpop.f32.mrf.mxu1  ;;  %v887_v20 = vpop.f32.mrf.mxu0  ;;  %v792_v37 = vld [vmem:[#allocation2 + $0x30] sm:$0x30] }
 0x1ac   : > { %v587_v59 = vpop.f32.mrf.mxu1 }
 0x1ae   : > { %1084 = vperm.xlu0 %1964, %v1081_v39   ;;  %1396 = vperm.xlu1 %1965, %v1393_v40   ;;  %v1097_v40 = vld [vmem:[#allocation2 + $0x28] sm:$0xc0] }
 0x1b2   : > { %1700 = vperm.xlu0 %1964, %v1697_v41   ;;  %778 = vperm.xlu1 %1965, %v775_v42  }
 0x1b6   : > { %1092 = vperm.xlu0 %1964, %v1089_v43   ;;  %1404 = vperm.xlu1 %1965, %v1401_v44  }
 0x1ba   : > { %1708 = vperm.xlu0 %1964, %v1705_v45   ;;  %786 = vperm.xlu1 %1965, %v783_v46   ;;  %v1098_v46 = vld [vmem:[#allocation2 + $0x30] sm:$0xc0] }
 0x210   : > { %v1750_v47 = vpop.permute.xlu0 %1749  ;;  %v1738_v52 = vpop.permute.xlu1 %1737 }
 0x211   : > { %v1745_v51 = vmax.f32 %v1731_v50, %v1738_v52 }
 0x213   : > { %v1760_v58 = vmax.f32 %v1745_v51, %v1750_v47 }
 0x214   : > { %v1740_v49 = vpop.permute.xlu0 %1739  ;;  %v1752_v56 = vpop.permute.xlu1 %1751 }
 0x215   : > { %v1741_v53 = vsel %vm692_vm8, %v1738_v52, %v1740_v49  ;;  %v1755_v61 = vsel %vm998_vm10, %v1750_v47, %v1752_v56  ;;  %v1747_v62 = vmax.f32 %v1733_v24, %v1740_v49  ;;  %v1769_v2 = vmul.f32 %v1767_v48, %v1760_v58  ;;  %v889_v24 = vpop.f32.mrf.mxu0 }
 0x216   : > { %v1746_v57 = vmax.f32 %v1732_v23, %v1741_v53  ;;  %v795_v47 = vrot.slane %v791_v36, 4 }
 0x218   : > { %v1754_v55 = vpop.permute.xlu0 %1753  ;;  %v1761_v63 = vmax.f32 %v1746_v57, %v1755_v61 }
 0x219   : > { %v1756_v60 = vsel %vm998_vm10, %v1752_v56, %v1754_v55 }
 0x21a   : > { %v1762_v1 = vmax.f32 %v1747_v62, %v1756_v60  ;;  %v1770_v7 = vmul.f32 %v1767_v48, %v1761_v63  ;;  %v1102_v62 = vrot.slane %v1098_v46, 6 }
 0x21c   : > { %v1788_v6 = vpop.permute.xlu0 %1787  ;;  %v1771_v8 = vmul.f32 %v1767_v48, %v1762_v1  ;;  %v796_v48 = vrot.slane %v792_v37, 4 }
 0x21e   : > { %v673_v3 = vpop.f32.mrf.mxu1 }
 0x21f   : > { %v674_v21 = vadd.f32 %v673_v3, %v585_v54  ;;  %v1101_v54 = vrot.slane %v1097_v40, 6 }
 0x220   : > { %v675_v10 = vpop.f32.mrf.mxu1 }
 0x221   : > { %v1776_v4 = vpop.permute.xlu1 %1775  ;;  %v676_v0 = vadd.f32 %v675_v10, %v587_v59 }
 0x222   : > { %v1778_v5 = vadd.f32 %v1776_v4, %v1769_v2  ;;  %v1779_v11 = vadd.f32 %v1776_v4, %v1770_v7  ;;  %v1780_v13 = vadd.f32 %v1776_v4, %v1771_v8  ;;  %v768_v17 = vpop.f32.mrf.mxu1 }
 0x223   : > { %v773_v28 = vadd.f32 %v768_v17, %v674_v21 }
 0x224   : > { %v1795_v9 = vadd.f32 %v1788_v6, %v1778_v5  ;;  %v770_v22 = vpop.f32.mrf.mxu1 }
 0x225   : > { %v1790_v12 = vpop.permute.xlu1 %1789  ;;  %v774_v29 = vadd.f32 %v770_v22, %v676_v0 }
 0x226   : > { %v1791_v14 = vsel %vm692_vm8, %v1788_v6, %v1790_v12  ;;  %1801 = vrot.lane.b32.xlu0 %v1795_v9, %s1977_s19  ;;  %v1797_v16 = vadd.f32 %v1790_v12, %v1780_v13  ;;  %v1409_v13 = vld [vmem:[#allocation2 + $0x48] sm:$0x3] }
 0x227   : > { %v1796_v15 = vadd.f32 %v1791_v14, %v1779_v11 }
 0x229   : > { %v1085_v18 = vpop.permute.xlu0 %1084  ;;  %1803 = vrot.lane.b32.xlu1 %v1796_v15, %s1977_s19  ;;  %v1397_v19 = vpop.permute.xlu1 %1396 }
 0x22a   : > { %1805 = vrot.lane.b32.xlu0 %v1797_v16, %s1977_s19 }
 0x22d   : > { %v779_v23 = vpop.permute.xlu1 %778  ;;  %v2285_v26 = vpop.permute.xlu0 %1700 }
 0x22e   : > { %v976_v25 = vpop.f32.mrf.mxu1  ;;  %v781_v38 = vmul.f32 %v779_v23, %v773_v28  ;;  %v782_v39 = vmul.f32 %v779_v23, %v774_v29 }
 0x22f   : > { %v977_v27 = vadd.f32 %v976_v25, %v887_v20 }
 0x230   : > { %v978_v30 = vpop.f32.mrf.mxu1 }
 0x231   : > { %v1405_v31 = vpop.permute.xlu1 %1404  ;;  %v979_v32 = vadd.f32 %v978_v30, %v889_v24  ;;  %v1093_v42 = vpop.permute.xlu0 %1092 }
 0x232   : > { %v1074_v33 = vpop.f32.mrf.mxu0  ;;  %v1199_v34 = vpop.f32.mrf.mxu1 }
 0x233   : > { %v1079_v35 = vadd.f32 %v1074_v33, %v977_v27  ;;  %v1713_v27 = vld [vmem:[#allocation2 + $0x48] sm:$0xc] }
 0x234   : > { %v1076_v41 = vpop.f32.mrf.mxu0  ;;  %v1201_v52 = vpop.f32.mrf.mxu1  ;;  %v1717_v33 = vrot.slane %v1713_v27, 2 }
 0x235   : > { %v1087_v43 = vmul.f32 %v1085_v18, %v1079_v35  ;;  %v1080_v44 = vadd.f32 %v1076_v41, %v979_v32  ;;  %v787_v45 = vpop.permute.xlu1 %786  ;;  %v1709_v30 = vpop.permute.xlu0 %1708 }
 0x236   : > { %v789_v49 = vadd.f32 %v787_v45, %v781_v38  ;;  %v790_v50 = vadd.f32 %v787_v45, %v782_v39  ;;  %v1288_v51 = vpop.f32.mrf.mxu0 }
 0x237   : > { %v1095_v53 = vadd.f32 %v1093_v42, %v1087_v43  ;;  %v1088_v55 = vmul.f32 %v1085_v18, %v1080_v44  ;;  %v1289_v56 = vadd.f32 %v1288_v51, %v1199_v34  ;;  %v1410_v18 = vld [vmem:[#allocation2 + $0x50] sm:$0x3] }
 0x238   : > { %v799_v57 = vadd.f32 %v795_v47, %v789_v49  ;;  %v800_v58 = vadd.f32 %v796_v48, %v790_v50  ;;  %v1290_v59 = vpop.f32.mrf.mxu0 }
 0x239   : > { %v1105_v60 = vadd.f32 %v1101_v54, %v1095_v53  ;;  %v1096_v61 = vadd.f32 %v1093_v42, %v1088_v55  ;;  %v1291_v63 = vadd.f32 %v1290_v59, %v1201_v52 }
 0x23a   : > { %801 = vst [vmem:[%s2247_s20] sm:$0x3] %v799_v57  ;;  %802 = vst [vmem:[%s2247_s20 + $0x8] sm:$0x3] %v800_v58  ;;  %v1386_v1 = vpop.f32.mrf.mxu1  ;;  %v1505_v9 = vpop.f32.mrf.mxu0 }
 0x23b   : > { %v1109_v2 = vrot.slane %v1105_v60, 6  ;;  %v1106_v3 = vadd.f32 %v1102_v62, %v1096_v61  ;;  %v1391_v4 = vadd.f32 %v1386_v1, %v1289_v56 }
 0x23c   : > { %v1388_v5 = vpop.f32.mrf.mxu1  ;;  %v1507_v16 = vpop.f32.mrf.mxu0 }
 0x23d   : > { %1113 = vst [vmem:[%s2247_s20] sm:$0xc] %v1109_v2  ;;  %v1110_v6 = vrot.slane %v1106_v3, 6  ;;  %v1399_v7 = vmul.f32 %v1397_v19, %v1391_v4  ;;  %v1392_v8 = vadd.f32 %v1388_v5, %v1291_v63 }
 0x23e   : > { %v1593_v10 = vpop.f32.mrf.mxu1 }
 0x23f   : > { %1114 = vst [vmem:[%s2247_s20 + $0x8] sm:$0xc] %v1110_v6  ;;  %v1407_v11 = vadd.f32 %v1405_v31, %v1399_v7  ;;  %v1400_v12 = vmul.f32 %v1397_v19, %v1392_v8  ;;  %v1594_v20 = vadd.f32 %v1593_v10, %v1505_v9 }
 0x240   : > { %v1595_v17 = vpop.f32.mrf.mxu1 }
 0x241   : > { %v1411_v14 = vadd.f32 %v1409_v13, %v1407_v11  ;;  %v1408_v15 = vadd.f32 %v1405_v31, %v1400_v12  ;;  %v1596_v22 = vadd.f32 %v1595_v17, %v1507_v16  ;;  %v1714_v31 = vld [vmem:[#allocation2 + $0x50] sm:$0xc] }
 0x242   : > { %v1718_v37 = vrot.slane %v1714_v31, 2 }
 0x243   : > { %v1415_v21 = vrot.slane %v1411_v14, 4  ;;  %v1412_v0 = vadd.f32 %v1410_v18, %v1408_v15 }
 0x245   : > { %1419 = vst [vmem:[%s2247_s20] sm:$0x30] %v1415_v21  ;;  %v1416_v23 = vrot.slane %v1412_v0, 4  ;;  %v1690_v24 = vpop.f32.mrf.mxu0 }
 0x246   : > { %v1695_v25 = vadd.f32 %v1690_v24, %v1594_v20 }
 0x247   : > { %1420 = vst [vmem:[%s2247_s20 + $0x8] sm:$0x30] %v1416_v23  ;;  %v1692_v28 = vpop.f32.mrf.mxu0 }
 0x248   : > { %v1703_v19 = vmul.f32 %v2285_v26, %v1695_v25  ;;  %v1696_v29 = vadd.f32 %v1692_v28, %v1596_v22 }
 0x24a   : > { %v1711_v32 = vadd.f32 %v1709_v30, %v1703_v19  ;;  %v1704_v34 = vmul.f32 %v2285_v26, %v1696_v29 }
 0x24c   : > { %v1721_v35 = vadd.f32 %v1717_v33, %v1711_v32  ;;  %v1712_v36 = vadd.f32 %v1709_v30, %v1704_v34 }
 0x24e   : > { %v1725_v38 = vrot.slane %v1721_v35, 2  ;;  %v1722_v39 = vadd.f32 %v1718_v37, %v1712_v36 }
 0x250   : > { %1729 = vst [vmem:[%s2247_s20] sm:$0xc0] %v1725_v38  ;;  %v1726_v40 = vrot.slane %v1722_v39, 2 }
 0x252   : > { %1730 = vst [vmem:[%s2247_s20 + $0x8] sm:$0xc0] %v1726_v40 }
 0x298   : > { %v1802_v41 = vpop.permute.xlu0 %1801 }
 0x29b   : > { %v1804_v42 = vpop.permute.xlu1 %1803 }
 0x29c   : > { %v1807_v43 = vsel %vm597_vm7, %v1802_v41, %v1804_v42  ;;  %v1806_v44 = vpop.permute.xlu0 %1805 }
 0x29d   : > { %1811 = vst [vmem:[%s2247_s20 + $0x10] sm:$0x3] %v1807_v43  ;;  %v1808_v45 = vsel %vm597_vm7, %v1804_v42, %v1806_v44 }
 0x29e   : > { %1812 = vst [vmem:[%s2247_s20 + $0x18] sm:$0x3] %v1808_v45 }
 0x29f PF: > { %s18_s27 = sadd.s32 1, %s1973_s27  }
 0x2a0   : > { %p15_p4 = scmp.ge.s32.totalorder %s18_s27, 4  }
 0x2a2   :  { %17 = sbr.rel (!%p15_p4) target bundleno = 1 (0x1), region = 93 }

</bundles_post_ra>
